<compile_context>
chip_gen: v7x
topology: tpu7x:2x2x1
jax: 0.10.0
libtpu: 0.0.40
codegen_flags: <defaults>
</compile_context>

<pallas_src>
import functools
from dataclasses import dataclass

import jax
import jax.numpy as jnp
from jax import lax
from jax.experimental import pallas as pl
from jax.experimental.pallas import tpu as pltpu


@dataclass
class ModelArgs:
    vocab_size: int
    num_layers: int
    embed_dim: int
    hidden_size: int
    num_heads: int
    dropout: float = 0.1
    window_size: int = -1
    rotary_theta: int = 10000
    max_seq_len: int = 2048


_VMEM_LIMIT = 32 * 1024 * 1024  # safe scoped-VMEM budget on v5e/v6e/v7x


def _pick_tile(dim, preferred, align):
    """Largest tile <= preferred that divides `dim` and is `align`-aligned,
    falling back to the full dim (full-extent blocks are always legal)."""
    if dim <= preferred:
        return dim
    t = preferred - (preferred % align) if preferred % align else preferred
    while t >= align:
        if dim % t == 0:
            return t
        t -= align
    return dim


# ----------------------------------------------------------------------------
# Pallas kernels
# ----------------------------------------------------------------------------
def _matmul_bias_act_kernel(x_ref, w_ref, b_ref, o_ref, acc_ref, *, activation):
    """Tiled x @ w + b (optional GELU). K axis is grid axis 2 (accumulated)."""
    @pl.when(pl.program_id(2) == 0)
    def _():
        acc_ref[...] = jnp.zeros_like(acc_ref)

    acc_ref[...] += jnp.dot(
        x_ref[...].astype(jnp.bfloat16), w_ref[...],
        preferred_element_type=jnp.float32)

    @pl.when(pl.program_id(2) == pl.num_programs(2) - 1)
    def _():
        r = acc_ref[...] + b_ref[...]
        if activation == "gelu":
            r = jax.nn.gelu(r)
        o_ref[...] = r


def _matmul_bias_residual_kernel(x_ref, w_ref, b_ref, r_ref, o_ref, acc_ref):
    """Tiled residual + x @ w + b (residual add fused into the epilogue)."""
    @pl.when(pl.program_id(2) == 0)
    def _():
        acc_ref[...] = jnp.zeros_like(acc_ref)

    acc_ref[...] += jnp.dot(
        x_ref[...].astype(jnp.bfloat16), w_ref[...],
        preferred_element_type=jnp.float32)

    @pl.when(pl.program_id(2) == pl.num_programs(2) - 1)
    def _():
        o_ref[...] = r_ref[...] + acc_ref[...] + b_ref[...]


def _ln_matmul_bias_act_kernel(x_ref, g_ref, bl_ref, w_ref, b_ref, o_ref, *,
                               activation):
    """LayerNorm fused into the matmul prologue (K = D kept resident)."""
    x = x_ref[...]
    mean = jnp.mean(x, axis=-1, keepdims=True)
    var = jnp.mean(jnp.square(x - mean), axis=-1, keepdims=True)
    xn = (x - mean) * lax.rsqrt(var + 1e-5) * g_ref[...] + bl_ref[...]
    r = jnp.dot(xn.astype(jnp.bfloat16), w_ref[...],
                preferred_element_type=jnp.float32) + b_ref[...]
    if activation == "gelu":
        r = jax.nn.gelu(r)
    o_ref[...] = r


def _layernorm_kernel(x_ref, g_ref, b_ref, o_ref):
    x = x_ref[...]
    mean = jnp.mean(x, axis=-1, keepdims=True)
    var = jnp.mean(jnp.square(x - mean), axis=-1, keepdims=True)
    o_ref[...] = (x - mean) * lax.rsqrt(var + 1e-5) * g_ref[...] + b_ref[...]


def _flash_attn_kernel(q_ref, k_ref, v_ref, o_ref, m_sc, l_sc, acc_sc, *, scale):
    """Online-softmax attention; grid = (B*H, num_kv_blocks)."""
    kv = pl.program_id(1)

    @pl.when(kv == 0)
    def _():
        m_sc[...] = jnp.full_like(m_sc, -jnp.inf)
        l_sc[...] = jnp.zeros_like(l_sc)
        acc_sc[...] = jnp.zeros_like(acc_sc)

    q = q_ref[0].astype(jnp.bfloat16)          # (S, Dh)
    k = k_ref[0].astype(jnp.bfloat16)          # (tkv, Dh)
    v = v_ref[0].astype(jnp.bfloat16)          # (tkv, Dh)

    # q @ k^T without an explicit transpose: contract the last dim of both.
    s = lax.dot_general(q, k, (((1,), (1,)), ((), ())),
                        preferred_element_type=jnp.float32) * scale  # (S, tkv)
    # TODO(synk): no padding / sliding-window mask is applied (window_size=-1).

    m_prev = m_sc[...]
    m_new = jnp.maximum(m_prev, jnp.max(s, axis=-1, keepdims=True))
    alpha = jnp.exp(m_prev - m_new)
    p = jnp.exp(s - m_new)
    l_sc[...] = alpha * l_sc[...] + jnp.sum(p, axis=-1, keepdims=True)
    acc_sc[...] = alpha * acc_sc[...] + jnp.dot(
        p.astype(jnp.bfloat16), v, preferred_element_type=jnp.float32)
    m_sc[...] = m_new

    @pl.when(kv == pl.num_programs(1) - 1)
    def _():
        o_ref[0] = (acc_sc[...] *
                    pl.reciprocal(l_sc[...], approx=True)).astype(o_ref.dtype)


# ----------------------------------------------------------------------------
# Pallas wrappers
# ----------------------------------------------------------------------------
def linear(x, w, b, *, activation=None):
    """Tiled, pipelined  x @ w + b  (optional GELU). x:(M,K) w:(K,N) b:(N,)."""
    M, K = x.shape
    N = w.shape[1]
    tm = _pick_tile(M, 256, 8)
    tn = _pick_tile(N, 256, 128)
    tk = _pick_tile(K, 512, 128)
    return pl.pallas_call(
        functools.partial(_matmul_bias_act_kernel, activation=activation),
        grid=(M // tm, N // tn, K // tk),
        in_specs=[
            pl.BlockSpec((tm, tk), lambda i, j, k: (i, k)),
            pl.BlockSpec((tk, tn), lambda i, j, k: (k, j)),
            pl.BlockSpec((1, tn), lambda i, j, k: (0, j)),
        ],
        out_specs=pl.BlockSpec((tm, tn), lambda i, j, k: (i, j)),
        out_shape=jax.ShapeDtypeStruct((M, N), jnp.float32),
        scratch_shapes=[pltpu.VMEM((tm, tn), jnp.float32)],
        compiler_params=pltpu.CompilerParams(
            dimension_semantics=("parallel", "parallel", "arbitrary"),
            vmem_limit_bytes=_VMEM_LIMIT),
    )(x, w.astype(jnp.bfloat16), b.reshape(1, N))


def linear_residual(x, w, b, residual):
    """Tiled  residual + x @ w + b  (skip-connection fused into epilogue)."""
    M, K = x.shape
    N = w.shape[1]
    tm = _pick_tile(M, 256, 8)
    tn = _pick_tile(N, 256, 128)
    tk = _pick_tile(K, 512, 128)
    return pl.pallas_call(
        _matmul_bias_residual_kernel,
        grid=(M // tm, N // tn, K // tk),
        in_specs=[
            pl.BlockSpec((tm, tk), lambda i, j, k: (i, k)),
            pl.BlockSpec((tk, tn), lambda i, j, k: (k, j)),
            pl.BlockSpec((1, tn), lambda i, j, k: (0, j)),
            pl.BlockSpec((tm, tn), lambda i, j, k: (i, j)),
        ],
        out_specs=pl.BlockSpec((tm, tn), lambda i, j, k: (i, j)),
        out_shape=jax.ShapeDtypeStruct((M, N), jnp.float32),
        scratch_shapes=[pltpu.VMEM((tm, tn), jnp.float32)],
        compiler_params=pltpu.CompilerParams(
            dimension_semantics=("parallel", "parallel", "arbitrary"),
            vmem_limit_bytes=_VMEM_LIMIT),
    )(x, w.astype(jnp.bfloat16), b.reshape(1, N), residual)


def ln_linear(x, g, bl, w, b, *, activation=None):
    """LayerNorm(x) @ w + b (optional GELU) in one call; K = D resident."""
    M, K = x.shape
    N = w.shape[1]
    tm = _pick_tile(M, 256, 8)
    tn = _pick_tile(N, 256, 128)
    return pl.pallas_call(
        functools.partial(_ln_matmul_bias_act_kernel, activation=activation),
        grid=(M // tm, N // tn),
        in_specs=[
            pl.BlockSpec((tm, K), lambda i, j: (i, 0)),
            pl.BlockSpec((1, K), lambda i, j: (0, 0)),
            pl.BlockSpec((1, K), lambda i, j: (0, 0)),
            pl.BlockSpec((K, tn), lambda i, j: (0, j)),
            pl.BlockSpec((1, tn), lambda i, j: (0, j)),
        ],
        out_specs=pl.BlockSpec((tm, tn), lambda i, j: (i, j)),
        out_shape=jax.ShapeDtypeStruct((M, N), jnp.float32),
        compiler_params=pltpu.CompilerParams(
            dimension_semantics=("parallel", "parallel"),
            vmem_limit_bytes=_VMEM_LIMIT),
    )(x, g.reshape(1, K), bl.reshape(1, K), w.astype(jnp.bfloat16),
      b.reshape(1, N))


def layernorm(x, g, b):
    """Standalone row-tiled LayerNorm (used only for the final output norm)."""
    M, D = x.shape
    tm = _pick_tile(M, 512, 8)
    return pl.pallas_call(
        _layernorm_kernel,
        grid=(M // tm,),
        in_specs=[
            pl.BlockSpec((tm, D), lambda i: (i, 0)),
            pl.BlockSpec((1, D), lambda i: (0, 0)),
            pl.BlockSpec((1, D), lambda i: (0, 0)),
        ],
        out_specs=pl.BlockSpec((tm, D), lambda i: (i, 0)),
        out_shape=jax.ShapeDtypeStruct((M, D), jnp.float32),
        compiler_params=pltpu.CompilerParams(
            dimension_semantics=("parallel",),
            vmem_limit_bytes=_VMEM_LIMIT),
    )(x, g.reshape(1, D), b.reshape(1, D))


def flash_attention(q, k, v):
    """q,k,v: (B*H, S, Dh) -> (B*H, S, Dh); KV-tiled online softmax."""
    BH, S, Dh = q.shape
    scale = 1.0 / (Dh ** 0.5)
    tkv = _pick_tile(S, 512, 8)
    q_spec = pl.BlockSpec((1, S, Dh), lambda b, kv: (b, 0, 0))
    kv_spec = pl.BlockSpec((1, tkv, Dh), lambda b, kv: (b, kv, 0))
    return pl.pallas_call(
        functools.partial(_flash_attn_kernel, scale=scale),
        grid=(BH, S // tkv),
        in_specs=[q_spec, kv_spec, kv_spec],
        out_specs=q_spec,
        out_shape=jax.ShapeDtypeStruct((BH, S, Dh), jnp.float32),
        scratch_shapes=[
            pltpu.VMEM((S, 1), jnp.float32),    # running max
            pltpu.VMEM((S, 1), jnp.float32),    # running denom
            pltpu.VMEM((S, Dh), jnp.float32),   # running output
        ],
        compiler_params=pltpu.CompilerParams(
            dimension_semantics=("parallel", "arbitrary"),
            vmem_limit_bytes=_VMEM_LIMIT),
    )(q, k, v)


# ----------------------------------------------------------------------------
# Rotary embedding helpers (plain JAX glue, interleaved-pair convention)
# ----------------------------------------------------------------------------
def precompute_freqs_cos_sin(dim, end, theta=10000.0):
    freqs = 1.0 / (theta ** (jnp.arange(0, dim, 2, dtype=jnp.float32) / dim))
    t = jnp.arange(end, dtype=jnp.float32)
    freqs = jnp.outer(t, freqs)               # (end, dim//2)
    return jnp.cos(freqs), jnp.sin(freqs)


def apply_rotary(x, cos_f, sin_f):
    """Interleaved complex rotation expressed with rolls (no stride-2 slicing).
      out[..., 2i]   = x[..., 2i]*cos[i] - x[..., 2i+1]*sin[i]
      out[..., 2i+1] = x[..., 2i]*sin[i] + x[..., 2i+1]*cos[i]
    cos_f/sin_f are (S, Dh) with each value repeated for the pair positions."""
    # TODO(synk): fuse into the attention kernel with pltpu.roll for large Dh.
    Dh = x.shape[-1]
    parity = jnp.arange(Dh) % 2
    partner = jnp.where(parity == 0,
                        jnp.roll(x, -1, axis=-1),
                        jnp.roll(x, 1, axis=-1))
    sign = jnp.where(parity == 0, -1.0, 1.0)
    c = cos_f[None, :, None, :]
    s = sin_f[None, :, None, :]
    return x * c + partner * sign * s


# ----------------------------------------------------------------------------
# Parameters (deterministic synthetic init)
# ----------------------------------------------------------------------------
def init_params(key, args: ModelArgs):
    D, Hsz, V = args.embed_dim, args.hidden_size, args.vocab_size
    keys = jax.random.split(key, 2 + args.num_layers)

    def w(k, shape, scale=0.02):
        return jax.random.normal(k, shape, dtype=jnp.float32) * scale

    params = {
        "embedding": w(keys[0], (V, D)),
        "out_ln_g": jnp.ones((D,), jnp.float32),
        "out_ln_b": jnp.zeros((D,), jnp.float32),
        "mlm_w": w(keys[1], (D, V)),
        "mlm_b": jnp.zeros((V,), jnp.float32),
        "layers": [],
    }
    for li in range(args.num_layers):
        lk = jax.random.split(keys[2 + li], 4)
        params["layers"].append({
            "ln1_g": jnp.ones((D,), jnp.float32),
            "ln1_b": jnp.zeros((D,), jnp.float32),
            "ln2_g": jnp.ones((D,), jnp.float32),
            "ln2_b": jnp.zeros((D,), jnp.float32),
            # q/k/v projections fused into one (D, 3D) weight
            "w_qkv": w(lk[0], (D, 3 * D)), "b_qkv": jnp.zeros((3 * D,), jnp.float32),
            "wo": w(lk[1], (D, D)), "bo": jnp.zeros((D,), jnp.float32),
            "w1": w(lk[2], (D, Hsz)), "b1": jnp.zeros((Hsz,), jnp.float32),
            "w2": w(lk[3], (Hsz, D)), "b2": jnp.zeros((D,), jnp.float32),
        })
    return params


# ----------------------------------------------------------------------------
# Forward pass (dropout layers are identity at inference)
# ----------------------------------------------------------------------------
def encoder_block(h2d, lp, cos_f, sin_f, B, S, num_heads):
    D = h2d.shape[-1]
    H = num_heads
    Dh = D // H

    # ---- attention sub-block: x = x + Wo·attn(rotary(qkv(norm1(x)))) ----
    qkv = ln_linear(h2d, lp["ln1_g"], lp["ln1_b"], lp["w_qkv"], lp["b_qkv"])
    q = qkv[:, 0 * D:1 * D].reshape(B, S, H, Dh)
    k = qkv[:, 1 * D:2 * D].reshape(B, S, H, Dh)
    v = qkv[:, 2 * D:3 * D].reshape(B, S, H, Dh)
    q = apply_rotary(q, cos_f, sin_f)
    k = apply_rotary(k, cos_f, sin_f)
    # TODO(synk): head transposes kept in XLA; a (B,S,H,Dh) BlockSpec layout
    # would need H-sized last-two-dims blocks (invalid at small demo Dh/H).
    q = q.transpose(0, 2, 1, 3).reshape(B * H, S, Dh)
    k = k.transpose(0, 2, 1, 3).reshape(B * H, S, Dh)
    v = v.transpose(0, 2, 1, 3).reshape(B * H, S, Dh)
    o = flash_attention(q, k, v)
    o = o.reshape(B, H, S, Dh).transpose(0, 2, 1, 3).reshape(B * S, D)
    h2d = linear_residual(o, lp["wo"], lp["bo"], h2d)

    # ---- feed-forward sub-block: x = x + w2·gelu(w1·norm2(x)) ----
    # TODO(synk): FeedFowardBlock activation not shown in reference; GELU assumed.
    ff = ln_linear(h2d, lp["ln2_g"], lp["ln2_b"], lp["w1"], lp["b1"],
                   activation="gelu")
    h2d = linear_residual(ff, lp["w2"], lp["b2"], h2d)
    return h2d


def encoder_mlm_forward(params, args: ModelArgs, x_ids, masked_ids):
    B, S = x_ids.shape
    D = args.embed_dim
    Dh = D // args.num_heads
    cos, sin = precompute_freqs_cos_sin(Dh, args.max_seq_len,
                                        float(args.rotary_theta))
    cos_f = jnp.repeat(cos[:S], 2, axis=-1)      # (S, Dh), pair-expanded
    sin_f = jnp.repeat(sin[:S], 2, axis=-1)

    # Embedding lookup kept in XLA (gather); kernels start from the 2-D slab.
    h = params["embedding"][x_ids].reshape(B * S, D)
    for lp in params["layers"]:
        h = encoder_block(h, lp, cos_f, sin_f, B, S, args.num_heads)
    h = layernorm(h, params["out_ln_g"], params["out_ln_b"])
    last_hidden = h.reshape(B, S, D)

    # TODO(synk): masked-row gather could be fused into the MLM-head kernel via
    # PrefetchScalarGridSpec + pl.Element; kept host-side (dynamic count).
    masked_hidden = h[masked_ids, :]
    logits = linear(masked_hidden, params["mlm_w"], params["mlm_b"])
    return logits, last_hidden


# ----------------------------------------------------------------------------
if __name__ == "__main__":
    args = ModelArgs(
        vocab_size=64,
        num_layers=2,
        embed_dim=32,
        hidden_size=64,
        num_heads=4,
        dropout=0.1,
        max_seq_len=64,
    )
    B, S = 2, 16

    key = jax.random.PRNGKey(0)
    k_par, k_ids, k_mask = jax.random.split(key, 3)

    params = init_params(k_par, args)
    x_ids = jax.random.randint(k_ids, (B, S), 0, args.vocab_size, dtype=jnp.int32)
    mask = (jax.random.uniform(k_mask, (B, S)) < 0.25).astype(jnp.int32)
    # torch.nonzero produces a dynamically-shaped index list; compute it on the
    # host with the concrete mask (same semantics, done outside the kernels).
    masked_ids = jnp.flatnonzero(mask.reshape(-1))
    if masked_ids.size == 0:
        masked_ids = jnp.array([0], dtype=jnp.int32)

    logits, last_hidden = encoder_mlm_forward(params, args, x_ids, masked_ids)
    jax.block_until_ready((logits, last_hidden))

    assert logits.shape == (masked_ids.shape[0], args.vocab_size)
    assert last_hidden.shape == (B, S, args.embed_dim)
    assert bool(jnp.isfinite(logits).all())
    assert bool(jnp.isfinite(last_hidden).all())
    print("KERNEL_OK")
</pallas_src>

<mosaic_0001>
module attributes {stable_mosaic.version = 11 : i64} {
  func.func @_ln_matmul_bias_act_kernel(%arg0: i32, %arg1: i32, %arg2: memref<32x32xf32, #tpu.memory_space<vmem>>, %arg3: memref<1x32xf32, #tpu.memory_space<vmem>>, %arg4: memref<1x32xf32, #tpu.memory_space<vmem>>, %arg5: memref<32x96xbf16, #tpu.memory_space<vmem>>, %arg6: memref<1x96xf32, #tpu.memory_space<vmem>>, %arg7: memref<32x96xf32, #tpu.memory_space<vmem>>) attributes {dimension_semantics = [#tpu.dimension_semantics<parallel>, #tpu.dimension_semantics<parallel>], iteration_bounds = array<i64: 1, 1>, scalar_prefetch = 0 : i64, scratch_operands = 0 : i64, tpu.core_type = #tpu.core_type<tc>, window_params = [{transform_indices = @transform_0, window_bounds = array<i64: 32, 32>}, {pipeline_mode = #tpu.pipeline_mode<synchronous>, transform_indices = @transform_1, window_bounds = array<i64: 1, 32>}, {pipeline_mode = #tpu.pipeline_mode<synchronous>, transform_indices = @transform_2, window_bounds = array<i64: 1, 32>}, {transform_indices = @transform_3, window_bounds = array<i64: 32, 96>}, {transform_indices = @transform_4, window_bounds = array<i64: 1, 96>}, {transform_indices = @transform_5, window_bounds = array<i64: 32, 96>}]} {
    %c0 = arith.constant 0 : index
    %c0_0 = arith.constant 0 : index
    %0 = vector.load %arg2[%c0, %c0_0] : memref<32x32xf32, #tpu.memory_space<vmem>>, vector<32x32xf32>
    %cst = arith.constant dense<0.000000e+00> : vector<32xf32>
    %1 = vector.multi_reduction <add>, %0, %cst [1] : vector<32x32xf32> to vector<32xf32>
    %2 = vector.shape_cast %1 : vector<32xf32> to vector<32x1xf32>
    %cst_1 = arith.constant 3.200000e+01 : f32
    %3 = vector.broadcast %cst_1 : f32 to vector<32x1xf32>
    %4 = arith.divf %2, %3 : vector<32x1xf32>
    %5 = vector.broadcast %4 : vector<32x1xf32> to vector<32x32xf32>
    %6 = arith.subf %0, %5 : vector<32x32xf32>
    %7 = arith.mulf %6, %6 : vector<32x32xf32>
    %cst_2 = arith.constant dense<0.000000e+00> : vector<32xf32>
    %8 = vector.multi_reduction <add>, %7, %cst_2 [1] : vector<32x32xf32> to vector<32xf32>
    %9 = vector.shape_cast %8 : vector<32xf32> to vector<32x1xf32>
    %cst_3 = arith.constant 3.200000e+01 : f32
    %10 = vector.broadcast %cst_3 : f32 to vector<32x1xf32>
    %11 = arith.divf %9, %10 : vector<32x1xf32>
    %12 = vector.broadcast %4 : vector<32x1xf32> to vector<32x32xf32>
    %13 = arith.subf %0, %12 : vector<32x32xf32>
    %cst_4 = arith.constant 9.99999974E-6 : f32
    %14 = vector.broadcast %cst_4 : f32 to vector<32x1xf32>
    %15 = arith.addf %11, %14 : vector<32x1xf32>
    %16 = math.rsqrt %15 : vector<32x1xf32>
    %17 = vector.broadcast %16 : vector<32x1xf32> to vector<32x32xf32>
    %18 = arith.mulf %13, %17 : vector<32x32xf32>
    %c0_5 = arith.constant 0 : index
    %c0_6 = arith.constant 0 : index
    %19 = vector.load %arg3[%c0_5, %c0_6] : memref<1x32xf32, #tpu.memory_space<vmem>>, vector<1x32xf32>
    %20 = vector.broadcast %19 : vector<1x32xf32> to vector<32x32xf32>
    %21 = arith.mulf %18, %20 : vector<32x32xf32>
    %c0_7 = arith.constant 0 : index
    %c0_8 = arith.constant 0 : index
    %22 = vector.load %arg4[%c0_7, %c0_8] : memref<1x32xf32, #tpu.memory_space<vmem>>, vector<1x32xf32>
    %23 = vector.broadcast %22 : vector<1x32xf32> to vector<32x32xf32>
    %24 = arith.addf %21, %23 : vector<32x32xf32>
    %25 = arith.truncf %24 : vector<32x32xf32> to vector<32x32xbf16>
    %c0_9 = arith.constant 0 : index
    %c0_10 = arith.constant 0 : index
    %26 = vector.load %arg5[%c0_9, %c0_10] : memref<32x96xbf16, #tpu.memory_space<vmem>>, vector<32x96xbf16>
    %cst_11 = arith.constant dense<0.000000e+00> : vector<32x96xf32>
    %27 = tpu.matmul %25, %26, %cst_11 {dimension_numbers = #tpu.dot_dimension_numbers<[1], [0], [0], [1], [0, 0, 1, 1], [], []>} : vector<32x32xbf16>, vector<32x96xbf16>, vector<32x96xf32> -> vector<32x96xf32>
    %c0_12 = arith.constant 0 : index
    %c0_13 = arith.constant 0 : index
    %28 = vector.load %arg6[%c0_12, %c0_13] : memref<1x96xf32, #tpu.memory_space<vmem>>, vector<1x96xf32>
    %29 = vector.broadcast %28 : vector<1x96xf32> to vector<32x96xf32>
    %30 = arith.addf %27, %29 : vector<32x96xf32>
    %c0_14 = arith.constant 0 : index
    %c0_15 = arith.constant 0 : index
    %31 = vector.load %arg7[%c0_14, %c0_15] : memref<32x96xf32, #tpu.memory_space<vmem>>, vector<32x96xf32>
    tpu.vector_store %arg7[%c0_14, %c0_15], %30 {strides = array<i32>} : memref<32x96xf32, #tpu.memory_space<vmem>>, vector<32x96xf32>,
    return
  }
  func.func @transform_0(%arg0: i32, %arg1: i32) -> (i32, i32) {
    %c0_i32 = arith.constant 0 : i32
    %c0_i32_0 = arith.constant 0 : i32
    return %arg0, %c0_i32 : i32, i32
  }
  func.func @transform_1(%arg0: i32, %arg1: i32) -> (i32, i32) {
    %c0_i32 = arith.constant 0 : i32
    %c0_i32_0 = arith.constant 0 : i32
    %c0_i32_1 = arith.constant 0 : i32
    return %c0_i32, %c0_i32_0 : i32, i32
  }
  func.func @transform_2(%arg0: i32, %arg1: i32) -> (i32, i32) {
    %c0_i32 = arith.constant 0 : i32
    %c0_i32_0 = arith.constant 0 : i32
    %c0_i32_1 = arith.constant 0 : i32
    return %c0_i32, %c0_i32_0 : i32, i32
  }
  func.func @transform_3(%arg0: i32, %arg1: i32) -> (i32, i32) {
    %c0_i32 = arith.constant 0 : i32
    %c0_i32_0 = arith.constant 0 : i32
    return %c0_i32, %arg1 : i32, i32
  }
  func.func @transform_4(%arg0: i32, %arg1: i32) -> (i32, i32) {
    %c0_i32 = arith.constant 0 : i32
    %c0_i32_0 = arith.constant 0 : i32
    return %c0_i32, %arg1 : i32, i32
  }
  func.func @transform_5(%arg0: i32, %arg1: i32) -> (i32, i32) {
    %c0_i32 = arith.constant 0 : i32
    return %arg0, %arg1 : i32, i32
  }
}

</mosaic_0001>

<bundles_post_ra>
// kernel: tpu_custom_call.1
= control target key start
LH: loop header
LB: loop body
LE: loop exit
PB: predicated region body
PF: predicated region fallthrough
CT: control target
= control target key end

     0   :  { %10 = vsyncpa [#allocation3], 0  ;;  %s439_s0 = inlined_call_operand.hbm [shape: f32[32,32], index: 0, kind: input, shape index: {}]   ;;  %s440_s1 = inlined_call_operand.vmem [shape: f32[1,32], index: 1, kind: input, shape index: {}]   ;;  %s441_s2 = inlined_call_operand.vmem [shape: f32[1,32], index: 2, kind: input, shape index: {}]   ;;  %s442_s3 = inlined_call_operand.hbm [shape: bf16[32,96], index: 3, kind: input, shape index: {}]   ;;  %s443_s4 = inlined_call_operand.vmem [shape: f32[1,96], index: 4, kind: input, shape index: {}]   ;;  %s444_s5 = inlined_call_operand.hbm [shape: f32[32,96], index: 5, kind: output, shape index: {}]  }
   0x1   :  { %11 = vsyncpa [#allocation6], 0 }
   0x2   :  { %12 = vsyncpa [#allocation4], 0  ;;  %s341_s18 = smov [#allocation2]   ;;  %s269_s22 = scalar_lea.hbm %s439_s0, 512 }
   0x3   :  { %s18_s19 = sshll.u32 %s341_s18, 4  ;;  %p270_p0 = scmp.ne.s32.totalorder %s439_s0, %s269_s22  ;;  %s19_s19 = int_to_ptr.vmem [resolvable:$true] %s18_s19 }
   0x4   :  { %p273_p1 = scmp.lt.u32.totalorder %s269_s22, %s439_s0 }
   0x6   :  { %p275_p2 = pnand %p273_p1, %p270_p0 }
   0x8   :  { %278 = shalt.err (!%p275_p2)
}
   0x9   :  { %s279_s27 = scalar_lea.vmem %s19_s19, 512  ;;  %p284_p4 = scmp.lt.s32.totalorder %s19_s19, %s19_s19 }
   0xa   :  { %p280_p3 = scmp.ne.s32.totalorder %s19_s19, %s279_s27  ;;  %p285_p5 = scmp.lt.s32.totalorder %s279_s27, %s279_s27 }
   0xc   :  { %p286_p6 = por %p285_p5, %p284_p4 }
   0xe   :  { %p287_p7 = pnand %p286_p6, %p280_p3 }
  0x10   :  { %290 = shalt.err (!%p287_p7)
}
  0x11   :  { %s342_s28 = smov 128   ;;  %s343_s29 = smov 8  }
  0x12   :  { %24 = dma.hbm_to_vmem [thread:$0]  %s439_s0, 512, %s19_s19, [#allocation3], %s342_s28, %s342_s28, %s343_s29  }
  0x13   :  { %s344_s7 = smov [#allocation5]   ;;  %s291_s11 = scalar_lea.hbm %s442_s3, 256 }
  0x14   :  { %s34_s8 = sshll.u32 %s344_s7, 4  ;;  %p292_p8 = scmp.ne.s32.totalorder %s442_s3, %s291_s11  ;;  %s35_s8 = int_to_ptr.vmem [resolvable:$true] %s34_s8 }
  0x15   :  { %p295_p9 = scmp.lt.u32.totalorder %s291_s11, %s442_s3 }
  0x17   :  { %p297_p10 = pnand %p295_p9, %p292_p8 }
  0x19   :  { %300 = shalt.err (!%p297_p10)
}
  0x1a   :  { %s301_s16 = scalar_lea.vmem %s35_s8, 256  ;;  %p306_p12 = scmp.lt.s32.totalorder %s35_s8, %s35_s8 }
  0x1b   :  { %p302_p11 = scmp.ne.s32.totalorder %s35_s8, %s301_s16  ;;  %p307_p13 = scmp.lt.s32.totalorder %s301_s16, %s301_s16 }
  0x1d   :  { %p308_p0 = por %p307_p13, %p306_p12 }
  0x1f   :  { %p309_p1 = pnand %p308_p0, %p302_p11 }
  0x21   :  { %312 = shalt.err (!%p309_p1)
}
  0x22   :  { %s345_s0 = smov 64   ;;  %s346_s17 = smov 4  }
  0x23   :  { %40 = dma.hbm_to_vmem [thread:$0]  %s442_s3, 256, %s35_s8, [#allocation6], %s345_s0, %s345_s0, %s346_s17  }
  0x24   :  { %335 = dma.done.wait [#allocation3], 512  }
  0x25   :  { %336 = vsyncadd [#allocation3], 4294966784 }
  0x26   :  { %337 = dma.done.wait [#allocation6], 256  }
  0x27   :  { %338 = vsyncadd [#allocation6], 4294967040  ;;  %vm54_vm0 = vcmask 261120   ;;  %v50_v0 = vld [vmem:[#allocation2] sm:$0xff]  ;;  %v52_v1 = vld [vmem:[#allocation2 + $0x10] sm:$0xff]  ;;  %vm210_vm1 = vcmask 785408  }
  0x28   :  { %v51_v2 = vld [vmem:[#allocation2 + $0x8] sm:$0xff]  ;;  %v55_v3 = vsel %vm54_vm0, %v50_v0, 0.0  ;;  %v61_v4 = vsel %vm54_vm0, %v52_v1, 0.0  ;;  %v53_v5 = vld [vmem:[#allocation2 + $0x18] sm:$0xff]  ;;  %v259_v28 = vld [vmem:[#allocation5] sm:$0xff]  }
  0x29   :  { %56 = vadd.xlane.f32.xlu0 %v55_v3  ;;  %62 = vadd.xlane.f32.xlu1 %v61_v4  ;;  %v58_v6 = vsel %vm54_vm0, %v51_v2, 0.0  ;;  %v64_v7 = vsel %vm54_vm0, %v53_v5, 0.0  ;;  %v260_v29 = vld [vmem:[#allocation5 + $0x8] sm:$0xff]   ;;  %v233_v44 = vld [vmem:[%s440_s1] ss:$0 sm:$0xff] }
  0x2a   :  { %244 = vmatprep.subr.bf16.mxu0 %v259_v28  ;;  %v234_v50 = vld [vmem:[%s441_s2] ss:$0 sm:$0xff]  ;;  %s347_s2 = smov [#allocation7]  }
  0x2b   :  { %245 = vmatpush3.bf16.msra.mxu0 %v259_v28  ;;  %v235_v62 = vld [vmem:[%s443_s4] ss:$0 sm:$0xff]  ;;  %s220_s24 = sshll.u32 %s347_s2, 4  ;;  %s221_s24 = int_to_ptr.vmem [resolvable:$true] %s220_s24 }
  0x2c   :  { %246 = vmatprep.subr.bf16.mxu0 %v260_v29  ;;  %s313_s25 = scalar_lea.vmem %s221_s24, 512  ;;  %p318_p3 = scmp.lt.s32.totalorder %s221_s24, %s221_s24 }
  0x2d   :  { %59 = vadd.xlane.f32.xlu0 %v58_v6  ;;  %65 = vadd.xlane.f32.xlu1 %v64_v7  ;;  %p314_p2 = scmp.ne.s32.totalorder %s221_s24, %s313_s25  ;;  %p319_p4 = scmp.lt.s32.totalorder %s313_s25, %s313_s25 }
  0x2f   :  { %247 = vmatpush3.bf16.msra.mxu0 %v260_v29  ;;  %p320_p5 = por %p319_p4, %p318_p3 }
  0x31   :  { %p321_p6 = pnand %p320_p5, %p314_p2 }
  0xb6   :  { %v57_v8 = vpop.xlane.xlu0 %56  ;;  %v63_v9 = vpop.xlane.xlu1 %62 }
  0xb7   :  { %v68_v10 = vmul.f32 0.03125, %v57_v8  ;;  %v70_v11 = vmul.f32 0.03125, %v63_v9 }
  0xb9   :  { %v72_v12 = vsub.f32 %v50_v0, %v68_v10  ;;  %v74_v13 = vsub.f32 %v52_v1, %v70_v11 }
  0xba   :  { %v60_v14 = vpop.xlane.xlu0 %59  ;;  %v66_v15 = vpop.xlane.xlu1 %65 }
  0xbb   :  { %v69_v16 = vmul.f32 0.03125, %v60_v14  ;;  %v71_v17 = vmul.f32 0.03125, %v66_v15  ;;  %v76_v18 = vmul.f32 %v72_v12, %v72_v12  ;;  %v78_v19 = vmul.f32 %v74_v13, %v74_v13 }
  0xbd   :  { %v73_v20 = vsub.f32 %v51_v2, %v69_v16  ;;  %v75_v21 = vsub.f32 %v53_v5, %v71_v17  ;;  %v80_v22 = vsel %vm54_vm0, %v76_v18, 0.0  ;;  %v86_v23 = vsel %vm54_vm0, %v78_v19, 0.0 }
  0xbe   :  { %81 = vadd.xlane.f32.xlu0 %v80_v22 }
  0xbf   :  { %v77_v24 = vmul.f32 %v73_v20, %v73_v20  ;;  %v79_v25 = vmul.f32 %v75_v21, %v75_v21 }
  0xc1   :  { %v83_v26 = vsel %vm54_vm0, %v77_v24, 0.0  ;;  %v89_v27 = vsel %vm54_vm0, %v79_v25, 0.0 }
  0xc2   :  { %87 = vadd.xlane.f32.xlu0 %v86_v23  ;;  %84 = vadd.xlane.f32.xlu1 %v83_v26 }
  0xc6   :  { %90 = vadd.xlane.f32.xlu1 %v89_v27 }
 0x14b   :  { %v82_v30 = vpop.xlane.xlu0 %81 }
 0x14c   :  { %v92_v31 = vmul.f32 0.03125, %v82_v30 }
 0x14e   :  { %v96_v32 = vadd.f32 1e-05, %v92_v31 }
 0x14f   :  { %v85_v33 = vpop.xlane.xlu1 %84  ;;  %v88_v34 = vpop.xlane.xlu0 %87 }
 0x150   :  { %261 = vrsqrt.f32 %v96_v32  ;;  %v93_v35 = vmul.f32 0.03125, %v85_v33  ;;  %v94_v36 = vmul.f32 0.03125, %v88_v34 }
 0x152   :  { %v97_v37 = vadd.f32 1e-05, %v93_v35  ;;  %v98_v38 = vadd.f32 1e-05, %v94_v36 }
 0x153   :  { %v91_v39 = vpop.xlane.xlu1 %90 }
 0x154   :  { %263 = vrsqrt.f32 %v97_v37  ;;  %v95_v40 = vmul.f32 0.03125, %v91_v39 }
 0x155   :  { %265 = vrsqrt.f32 %v98_v38 }
 0x156   :  { %v99_v41 = vadd.f32 1e-05, %v95_v40 }
 0x158   :  { %267 = vrsqrt.f32 %v99_v41 }
 0x15a   :  { %v262_v42 = vpop.eup %261 }
 0x15b   :  { %v104_v43 = vmul.f32 %v262_v42, %v72_v12 }
 0x15d   :  { %v115_v48 = vmul.f32 %v233_v44, %v104_v43 }
 0x15e   :  { %v264_v45 = vpop.eup %263 }
 0x15f   :  { %v266_v46 = vpop.eup %265  ;;  %v105_v47 = vmul.f32 %v264_v45, %v73_v20  ;;  %v126_v54 = vadd.f32 %v234_v50, %v115_v48 }
 0x160   :  { %v106_v49 = vmul.f32 %v266_v46, %v74_v13 }
 0x161   :  { %v116_v51 = vmul.f32 %v233_v44, %v105_v47 }
 0x162   :  { %v268_v52 = vpop.eup %267  ;;  %v117_v56 = vmul.f32 %v233_v44, %v106_v49 }
 0x163   :  { %v107_v53 = vmul.f32 %v268_v52, %v75_v21  ;;  %v127_v55 = vadd.f32 %v234_v50, %v116_v51 }
 0x164   :  { %v128_v59 = vadd.f32 %v234_v50, %v117_v56 }
 0x165   :  { %v130_v57 = vpack.c.bf16 %v127_v55, %v126_v54  ;;  %v118_v58 = vmul.f32 %v233_v44, %v107_v53 }
 0x167   :  { %248 = vmatprep.mubr.msk.bf16.mxu0 %vm54_vm0, %v130_v57  ;;  %v129_v60 = vadd.f32 %v234_v50, %v118_v58 }
 0x169   :  { %v131_v61 = vpack.c.bf16 %v129_v60, %v128_v59 }
 0x16b   :  { %249 = vmatmul.mubr.msk.bf16.vlgmr.msra.gmra.mrb[0].mxu0 %vm54_vm0, %v131_v61 }
 0x23e   :  { %v250_v63 = vpop.f32.mrb[0].mxu0 }
 0x23f   :  { %v204_v0 = vadd.f32 %v250_v63, %v235_v62  ;;  %v195_v1 = vpop.f32.mrb[1].mxu0 }
 0x240   :  { %v196_v2 = vadd.f32 %v235_v62, %v195_v1  ;;  %v251_v3 = vpop.f32.mrb[2].mxu0 }
 0x241   :  { %213 = vst.msk [vmem:[#allocation7 + $0x10] sm:$0xff] %vm210_vm1, %v204_v0  ;;  %v207_v4 = vadd.f32 %v251_v3, %v235_v62  ;;  %v198_v5 = vpop.f32.mrb[3].mxu0 }
 0x242   :  { %211 = vst.msk [vmem:[#allocation7] sm:$0xff] %vm210_vm1, %v196_v2  ;;  %v199_v6 = vadd.f32 %v235_v62, %v198_v5 }
 0x243   :  { %214 = vst.msk [vmem:[#allocation7 + $0x18] sm:$0xff] %vm210_vm1, %v207_v4 }
 0x244   :  { %212 = vst.msk [vmem:[#allocation7 + $0x8] sm:$0xff] %vm210_vm1, %v199_v6 }
 0x245   :  { %324 = shalt.err (!%p321_p6)
}
 0x246   :  { %s325_s27 = scalar_lea.hbm %s444_s5, 512 }
 0x247   :  { %p326_p7 = scmp.ne.s32.totalorder %s444_s5, %s325_s27  ;;  %p329_p8 = scmp.lt.u32.totalorder %s325_s27, %s444_s5 }
 0x249   :  { %p331_p9 = pnand %p329_p8, %p326_p7 }
 0x24b   :  { %334 = shalt.err (!%p331_p9)
}
 0x24c   :  { %226 = dma.vmem_to_hbm [thread:$0]  %s221_s24, 512, %s444_s5, [#allocation4], %s342_s28, %s342_s28, %s343_s29  }
 0x24d   :  { %339 = dma.done.wait [#allocation4], 512  }
 0x24e   :  { %340 = vsyncadd [#allocation4], 4294966784 }
 0x24f   :  { %230 = vsyncpa [#allocation3], 1 }
 0x250   :  { %231 = vsyncpa [#allocation6], 1 }
 0x251   :  { %232 = vsyncpa [#allocation4], 1 }

</bundles_post_ra>
